<compile_context>
chip_gen: v6e
topology: v6e:2x2x1
jax: 0.10.0
libtpu: 0.0.40
codegen_flags: <defaults>
</compile_context>

<pallas_src>
import functools

import jax
import jax.numpy as jnp
from jax.experimental import pallas as pl
from jax.experimental.pallas import tpu as pltpu


def _round_up(x, m):
    return ((x + m - 1) // m) * m


def _actor_kernel(act_limit_ref,                      # SMEM scalar prefetch
                  obs_ref, w1_ref, b1_ref, w2_ref, b2_ref, wmu_ref, bmu_ref,
                  out_ref):
    # Fully fused MLP. Weights/biases use constant index_maps, so they are
    # DMA'd once and stay VMEM-resident across all batch tiles.
    x = obs_ref[...].astype(jnp.bfloat16)             # in-kernel cast (no wrapper pass)
    h1 = jnp.dot(x, w1_ref[...], preferred_element_type=jnp.float32) + b1_ref[...]
    h1 = jnp.maximum(h1, 0.0).astype(jnp.bfloat16)
    h2 = jnp.dot(h1, w2_ref[...], preferred_element_type=jnp.float32) + b2_ref[...]
    h2 = jnp.maximum(h2, 0.0).astype(jnp.bfloat16)
    mu = jnp.dot(h2, wmu_ref[...], preferred_element_type=jnp.float32) + bmu_ref[...]

    # wmu/bmu are lane-padded to 128 for a well-formed MXU matmul, but only the
    # real act_dim lanes are written back -> ~16x less HBM writeback traffic.
    act_dim = out_ref.shape[1]
    act_limit = act_limit_ref[0]
    out_ref[...] = (jnp.tanh(mu[:, :act_dim]) * act_limit).astype(out_ref.dtype)
    # TODO(synk): log_std head (clamp + exp) only affects the std of the Normal,
    # not dist.mean, so it is dead code for forward() and not emitted.


def prepare_params(params):
    """One-time parameter prep (do this OUTSIDE the rollout loop).

    Casts weights to bf16 (MXU feed) and zero-pads the mu head to 128 lanes so
    no per-call weight re-materialization happens in HBM.
    """
    f32, bf16 = jnp.float32, jnp.bfloat16
    hidden = params["w1"].shape[1]
    act_dim = params["wmu"].shape[1]
    act_pad = max(128, _round_up(act_dim, 128))
    wmu = jnp.zeros((hidden, act_pad), bf16).at[:, :act_dim].set(
        params["wmu"].astype(bf16))
    bmu = jnp.zeros((1, act_pad), f32).at[:, :act_dim].set(
        params["bmu"].astype(f32))
    return dict(
        w1=params["w1"].astype(bf16), b1=params["b1"].astype(f32),
        w2=params["w2"].astype(bf16), b2=params["b2"].astype(f32),
        wmu=wmu, bmu=bmu,
    )


@functools.partial(jax.jit, static_argnames=("act_dim", "batch_tile"))
def actor_forward(obs, prepped, act_limit, *, act_dim, batch_tile=None):
    """obs: (B, obs_dim) f32.  prepped: output of prepare_params()."""
    B, obs_dim = obs.shape
    hidden = prepped["w1"].shape[1]
    act_pad = prepped["wmu"].shape[1]

    # Batch tiling: big tiles amortize the ~0.35us/grid-step pipeline overhead;
    # keep >= 4 steps at large B so the "parallel" axis can shard across v7x's
    # two TensorCores. Small B -> one full-dim tile, no padding at all.
    if batch_tile is not None:
        tb = batch_tile
    elif B <= 512:
        tb = B
    else:
        tb = max(16, min(2048, _round_up(pl.cdiv(B, 4), 16)))
    n_tiles = pl.cdiv(B, tb)
    B_pad = n_tiles * tb

    obs_in = obs if B_pad == B else jnp.pad(obs, ((0, B_pad - B), (0, 0)))
    act_limit_arr = jnp.asarray(act_limit, jnp.float32).reshape(1)

    # index_maps receive the scalar-prefetch ref as a trailing positional arg.
    full = lambda shape: pl.BlockSpec(shape, lambda i, *_: (0,) * len(shape))

    flops = 2 * B_pad * (obs_dim * hidden + hidden * hidden + hidden * act_pad)
    bytes_accessed = (obs_in.size * 4
                      + (prepped["w1"].size + prepped["w2"].size
                         + prepped["wmu"].size) * 2
                      + (prepped["b1"].size + prepped["b2"].size
                         + prepped["bmu"].size) * 4
                      + B_pad * act_dim * 4)

    out = pl.pallas_call(
        _actor_kernel,
        out_shape=jax.ShapeDtypeStruct((B_pad, act_dim), jnp.float32),
        grid_spec=pltpu.PrefetchScalarGridSpec(
            num_scalar_prefetch=1,
            grid=(n_tiles,),
            in_specs=[
                pl.BlockSpec((tb, obs_dim), lambda i, *_: (i, 0)),  # obs tile
                full((obs_dim, hidden)),                            # W1 (resident)
                full((1, hidden)),                                  # b1
                full((hidden, hidden)),                             # W2
                full((1, hidden)),                                  # b2
                full((hidden, act_pad)),                            # Wmu (lane-padded)
                full((1, act_pad)),                                 # bmu (lane-padded)
            ],
            out_specs=pl.BlockSpec((tb, act_dim), lambda i, *_: (i, 0)),
        ),
        compiler_params=pltpu.CompilerParams(
            dimension_semantics=("parallel",),
            # Default scoped VMEM is ample at tb <= 2048; only raise it for huge
            # user-requested tiles (explicit headroom on v7x's 64 MiB part).
            vmem_limit_bytes=(48 * 1024 * 1024) if tb > 4096 else None,
        ),
        cost_estimate=pl.CostEstimate(
            flops=flops,
            transcendentals=B_pad * act_dim,
            bytes_accessed=bytes_accessed),
    )(act_limit_arr, obs_in, prepped["w1"], prepped["b1"], prepped["w2"],
      prepped["b2"], prepped["wmu"], prepped["bmu"])

    return out[:B]


def init_params(key, obs_dim, hidden, act_dim):
    """Deterministic synthetic init (PyTorch-style uniform fan-in scaling)."""
    ks = jax.random.split(key, 6)

    def linear(kw, kb, fan_in, fan_out):
        bound = 1.0 / jnp.sqrt(fan_in)
        # stored as (in, out) — pre-transposed relative to nn.Linear.weight
        w = jax.random.uniform(kw, (fan_in, fan_out), jnp.float32, -bound, bound)
        b = jax.random.uniform(kb, (1, fan_out), jnp.float32, -bound, bound)
        return w, b

    w1, b1 = linear(ks[0], ks[1], obs_dim, hidden)
    w2, b2 = linear(ks[2], ks[3], hidden, hidden)
    wmu, bmu = linear(ks[4], ks[5], hidden, act_dim)
    return dict(w1=w1, b1=b1, w2=w2, b2=b2, wmu=wmu, bmu=bmu)


def actor_reference(obs, params, act_limit):
    """Pure-JAX reference mirroring the kernel's mixed-precision math."""
    bf16, f32 = jnp.bfloat16, jnp.float32
    h1 = jnp.dot(obs.astype(bf16), params["w1"].astype(bf16),
                 preferred_element_type=f32) + params["b1"]
    h1 = jnp.maximum(h1, 0.0)
    h2 = jnp.dot(h1.astype(bf16), params["w2"].astype(bf16),
                 preferred_element_type=f32) + params["b2"]
    h2 = jnp.maximum(h2, 0.0)
    mu = jnp.dot(h2.astype(bf16), params["wmu"].astype(bf16),
                 preferred_element_type=f32) + params["bmu"]
    return jnp.tanh(mu) * act_limit


if __name__ == "__main__":
    key = jax.random.PRNGKey(0)
    B, OBS_DIM, HIDDEN, ACT_DIM = 8, 16, 256, 8
    ACT_LIMIT = 2.0

    k_obs, k_params = jax.random.split(key)
    obs = jax.random.normal(k_obs, (B, OBS_DIM), jnp.float32)
    params = init_params(k_params, OBS_DIM, HIDDEN, ACT_DIM)
    prepped = prepare_params(params)          # one-time weight prep (hoisted)

    out = actor_forward(obs, prepped, ACT_LIMIT, act_dim=ACT_DIM)
    out = jax.block_until_ready(out)

    ref = actor_reference(obs, params, ACT_LIMIT)
    assert out.shape == (B, ACT_DIM)
    assert jnp.allclose(out, ref, atol=1e-2, rtol=1e-2), "mismatch vs reference"
    print("KERNEL_OK")
</pallas_src>

<mosaic_0001>
module attributes {stable_mosaic.version = 11 : i64} {
  func.func @_actor_kernel(%arg0: i32, %arg1: memref<1xf32, #tpu.memory_space<smem>>, %arg2: memref<8x16xf32, #tpu.memory_space<vmem>>, %arg3: memref<16x256xbf16, #tpu.memory_space<vmem>>, %arg4: memref<1x256xf32, #tpu.memory_space<vmem>>, %arg5: memref<256x256xbf16, #tpu.memory_space<vmem>>, %arg6: memref<1x256xf32, #tpu.memory_space<vmem>>, %arg7: memref<256x128xbf16, #tpu.memory_space<vmem>>, %arg8: memref<1x128xf32, #tpu.memory_space<vmem>>, %arg9: memref<8x8xf32, #tpu.memory_space<vmem>>) attributes {dimension_semantics = [#tpu.dimension_semantics<parallel>], iteration_bounds = array<i64: 1>, scalar_prefetch = 1 : i64, scratch_operands = 0 : i64, tpu.core_type = #tpu.core_type<tc>, window_params = [{transform_indices = @transform_0, window_bounds = array<i64: 8, 16>}, {pipeline_mode = #tpu.pipeline_mode<synchronous>, transform_indices = @transform_1, window_bounds = array<i64: 16, 256>}, {pipeline_mode = #tpu.pipeline_mode<synchronous>, transform_indices = @transform_2, window_bounds = array<i64: 1, 256>}, {pipeline_mode = #tpu.pipeline_mode<synchronous>, transform_indices = @transform_3, window_bounds = array<i64: 256, 256>}, {pipeline_mode = #tpu.pipeline_mode<synchronous>, transform_indices = @transform_4, window_bounds = array<i64: 1, 256>}, {pipeline_mode = #tpu.pipeline_mode<synchronous>, transform_indices = @transform_5, window_bounds = array<i64: 256, 128>}, {pipeline_mode = #tpu.pipeline_mode<synchronous>, transform_indices = @transform_6, window_bounds = array<i64: 1, 128>}, {transform_indices = @transform_7, window_bounds = array<i64: 8, 8>}]} {
    %c0 = arith.constant 0 : index
    %c0_0 = arith.constant 0 : index
    %0 = vector.load %arg2[%c0, %c0_0] : memref<8x16xf32, #tpu.memory_space<vmem>>, vector<8x16xf32>
    %1 = arith.truncf %0 : vector<8x16xf32> to vector<8x16xbf16>
    %c0_1 = arith.constant 0 : index
    %c0_2 = arith.constant 0 : index
    %2 = vector.load %arg3[%c0_1, %c0_2] : memref<16x256xbf16, #tpu.memory_space<vmem>>, vector<16x256xbf16>
    %cst = arith.constant dense<0.000000e+00> : vector<8x256xf32>
    %3 = tpu.matmul %1, %2, %cst {dimension_numbers = #tpu.dot_dimension_numbers<[1], [0], [0], [1], [0, 0, 1, 1], [], []>} : vector<8x16xbf16>, vector<16x256xbf16>, vector<8x256xf32> -> vector<8x256xf32>
    %c0_3 = arith.constant 0 : index
    %c0_4 = arith.constant 0 : index
    %4 = vector.load %arg4[%c0_3, %c0_4] : memref<1x256xf32, #tpu.memory_space<vmem>>, vector<1x256xf32>
    %5 = vector.broadcast %4 : vector<1x256xf32> to vector<8x256xf32>
    %6 = arith.addf %3, %5 : vector<8x256xf32>
    %cst_5 = arith.constant 0.000000e+00 : f32
    %7 = vector.broadcast %cst_5 : f32 to vector<8x256xf32>
    %8 = arith.maximumf %6, %7 : vector<8x256xf32>
    %9 = arith.truncf %8 : vector<8x256xf32> to vector<8x256xbf16>
    %c0_6 = arith.constant 0 : index
    %c0_7 = arith.constant 0 : index
    %10 = vector.load %arg5[%c0_6, %c0_7] : memref<256x256xbf16, #tpu.memory_space<vmem>>, vector<256x256xbf16>
    %cst_8 = arith.constant dense<0.000000e+00> : vector<8x256xf32>
    %11 = tpu.matmul %9, %10, %cst_8 {dimension_numbers = #tpu.dot_dimension_numbers<[1], [0], [0], [1], [0, 0, 1, 1], [], []>} : vector<8x256xbf16>, vector<256x256xbf16>, vector<8x256xf32> -> vector<8x256xf32>
    %c0_9 = arith.constant 0 : index
    %c0_10 = arith.constant 0 : index
    %12 = vector.load %arg6[%c0_9, %c0_10] : memref<1x256xf32, #tpu.memory_space<vmem>>, vector<1x256xf32>
    %13 = vector.broadcast %12 : vector<1x256xf32> to vector<8x256xf32>
    %14 = arith.addf %11, %13 : vector<8x256xf32>
    %cst_11 = arith.constant 0.000000e+00 : f32
    %15 = vector.broadcast %cst_11 : f32 to vector<8x256xf32>
    %16 = arith.maximumf %14, %15 : vector<8x256xf32>
    %17 = arith.truncf %16 : vector<8x256xf32> to vector<8x256xbf16>
    %c0_12 = arith.constant 0 : index
    %c0_13 = arith.constant 0 : index
    %18 = vector.load %arg7[%c0_12, %c0_13] : memref<256x128xbf16, #tpu.memory_space<vmem>>, vector<256x128xbf16>
    %cst_14 = arith.constant dense<0.000000e+00> : vector<8x128xf32>
    %19 = tpu.matmul %17, %18, %cst_14 {dimension_numbers = #tpu.dot_dimension_numbers<[1], [0], [0], [1], [0, 0, 1, 1], [], []>} : vector<8x256xbf16>, vector<256x128xbf16>, vector<8x128xf32> -> vector<8x128xf32>
    %c0_15 = arith.constant 0 : index
    %c0_16 = arith.constant 0 : index
    %20 = vector.load %arg8[%c0_15, %c0_16] : memref<1x128xf32, #tpu.memory_space<vmem>>, vector<1x128xf32>
    %21 = vector.broadcast %20 : vector<1x128xf32> to vector<8x128xf32>
    %22 = arith.addf %19, %21 : vector<8x128xf32>
    %c0_17 = arith.constant 0 : index
    %23 = memref.load %arg1[%c0_17] : memref<1xf32, #tpu.memory_space<smem>>
    %24 = vector.extract_strided_slice %22 {offsets = [0, 0], sizes = [8, 8], strides = [1, 1]} : vector<8x128xf32> to vector<8x8xf32>
    %25 = math.tanh %24 : vector<8x8xf32>
    %26 = vector.broadcast %23 : f32 to vector<8x8xf32>
    %27 = arith.mulf %25, %26 : vector<8x8xf32>
    %c0_18 = arith.constant 0 : index
    %c0_19 = arith.constant 0 : index
    %28 = vector.load %arg9[%c0_18, %c0_19] : memref<8x8xf32, #tpu.memory_space<vmem>>, vector<8x8xf32>
    tpu.vector_store %arg9[%c0_18, %c0_19], %27 {strides = array<i32>} : memref<8x8xf32, #tpu.memory_space<vmem>>, vector<8x8xf32>,
    return
  }
  func.func @transform_0(%arg0: i32, %arg1: memref<1xf32, #tpu.memory_space<smem>>) -> (i32, i32) {
    %c0_i32 = arith.constant 0 : i32
    %c0_i32_0 = arith.constant 0 : i32
    return %arg0, %c0_i32 : i32, i32
  }
  func.func @transform_1(%arg0: i32, %arg1: memref<1xf32, #tpu.memory_space<smem>>) -> (i32, i32) {
    %c0_i32 = arith.constant 0 : i32
    %c0_i32_0 = arith.constant 0 : i32
    %c0_i32_1 = arith.constant 0 : i32
    return %c0_i32, %c0_i32_0 : i32, i32
  }
  func.func @transform_2(%arg0: i32, %arg1: memref<1xf32, #tpu.memory_space<smem>>) -> (i32, i32) {
    %c0_i32 = arith.constant 0 : i32
    %c0_i32_0 = arith.constant 0 : i32
    %c0_i32_1 = arith.constant 0 : i32
    return %c0_i32, %c0_i32_0 : i32, i32
  }
  func.func @transform_3(%arg0: i32, %arg1: memref<1xf32, #tpu.memory_space<smem>>) -> (i32, i32) {
    %c0_i32 = arith.constant 0 : i32
    %c0_i32_0 = arith.constant 0 : i32
    %c0_i32_1 = arith.constant 0 : i32
    return %c0_i32, %c0_i32_0 : i32, i32
  }
  func.func @transform_4(%arg0: i32, %arg1: memref<1xf32, #tpu.memory_space<smem>>) -> (i32, i32) {
    %c0_i32 = arith.constant 0 : i32
    %c0_i32_0 = arith.constant 0 : i32
    %c0_i32_1 = arith.constant 0 : i32
    return %c0_i32, %c0_i32_0 : i32, i32
  }
  func.func @transform_5(%arg0: i32, %arg1: memref<1xf32, #tpu.memory_space<smem>>) -> (i32, i32) {
    %c0_i32 = arith.constant 0 : i32
    %c0_i32_0 = arith.constant 0 : i32
    %c0_i32_1 = arith.constant 0 : i32
    return %c0_i32, %c0_i32_0 : i32, i32
  }
  func.func @transform_6(%arg0: i32, %arg1: memref<1xf32, #tpu.memory_space<smem>>) -> (i32, i32) {
    %c0_i32 = arith.constant 0 : i32
    %c0_i32_0 = arith.constant 0 : i32
    %c0_i32_1 = arith.constant 0 : i32
    return %c0_i32, %c0_i32_0 : i32, i32
  }
  func.func @transform_7(%arg0: i32, %arg1: memref<1xf32, #tpu.memory_space<smem>>) -> (i32, i32) {
    %c0_i32 = arith.constant 0 : i32
    %c0_i32_0 = arith.constant 0 : i32
    return %arg0, %c0_i32 : i32, i32
  }
}

</mosaic_0001>

<bundles_post_ra>
// kernel: actor_forward.1
= control target key start
LH: loop header
LB: loop body
LE: loop exit
PB: predicated region body
PF: predicated region fallthrough
CT: control target
= control target key end

     0   :  { %14 = vsyncpa [#allocation5], 0  ;;  %s948_s0 = inlined_call_operand.<no memory space> [shape: f32[1], index: 0, kind: input, shape index: {}]   ;;  %s949_s1 = inlined_call_operand.hbm [shape: f32[8,16], index: 1, kind: input, shape index: {}]   ;;  %s950_s2 = inlined_call_operand.hbm [shape: bf16[16,256], index: 2, kind: input, shape index: {}]   ;;  %s951_s3 = inlined_call_operand.vmem [shape: f32[1,256], index: 3, kind: input, shape index: {}]   ;;  %s952_s4 = inlined_call_operand.hbm [shape: bf16[256,256], index: 4, kind: input, shape index: {}]   ;;  %s953_s5 = inlined_call_operand.vmem [shape: f32[1,256], index: 5, kind: input, shape index: {}]   ;;  %s954_s6 = inlined_call_operand.hbm [shape: bf16[256,128], index: 6, kind: input, shape index: {}]   ;;  %s955_s7 = inlined_call_operand.vmem [shape: f32[1,128], index: 7, kind: input, shape index: {}]   ;;  %s956_s8 = inlined_call_operand.hbm [shape: f32[8,8], index: 8, kind: output, shape index: {}]  }
   0x1   :  { %15 = vsyncpa [#allocation8], 0 }
   0x2   :  { %16 = vsyncpa [#allocation11], 0 }
   0x3   :  { %17 = vsyncpa [#allocation6], 0  ;;  %s866_s27 = smov [#allocation7]  }
   0x4   :  { %s33_s28 = sshll.u32 %s866_s27, 4  ;;  %s34_s28 = int_to_ptr.vmem [resolvable:$true] %s33_s28 }
   0x5   :  { %s766_s29 = scalar_lea.vmem %s34_s28, 256  ;;  %p771_p1 = scmp.lt.s32.totalorder %s34_s28, %s34_s28 }
   0x6   :  { %p767_p0 = scmp.ne.s32.totalorder %s34_s28, %s766_s29  ;;  %p772_p2 = scmp.lt.s32.totalorder %s766_s29, %s766_s29 }
   0x8   :  { %p773_p3 = por %p772_p2, %p771_p1 }
   0xa   :  { %p774_p4 = pnand %p773_p3, %p767_p0 }
   0xc   :  { %777 = shalt.err (!%p774_p4)
}
   0xd   :  { %s867_s30 = smov 128   ;;  %s868_s9 = smov 8  }
   0xe   :  { %39 = dma.hbm_to_vmem [thread:$0]  %s950_s2, 256, %s34_s28, [#allocation8], %s867_s30, %s867_s30, %s868_s9  }
   0xf   :  { %s869_s12 = smov [#allocation4]   ;;  %s870_s14 = smov [#allocation9]  }
  0x10   :  { %s24_s13 = sshll.u32 %s869_s12, 4  ;;  %s47_s15 = sshll.u32 %s870_s14, 4  ;;  %s25_s13 = int_to_ptr.vmem [resolvable:$true] %s24_s13  ;;  %s48_s15 = int_to_ptr.vmem [resolvable:$true] %s47_s15 }
  0x11   :  { %s786_s16 = scalar_lea.vmem %s25_s13, 128  ;;  %p791_p6 = scmp.lt.s32.totalorder %s25_s13, %s25_s13 }
  0x12   :  { %p787_p5 = scmp.ne.s32.totalorder %s25_s13, %s786_s16  ;;  %p792_p7 = scmp.lt.s32.totalorder %s786_s16, %s786_s16 }
  0x14   :  { %p793_p8 = por %p792_p7, %p791_p6 }
  0x16   :  { %p794_p9 = pnand %p793_p8, %p787_p5 }
  0x18   :  { %797 = shalt.err (!%p794_p9)
}
  0x19   :  { %27 = dma.hbm_to_vmem [thread:$0]  %s949_s1, 128, %s25_s13, [#allocation5]  }
  0x1a   :  { %s806_s19 = scalar_lea.vmem %s48_s15, 4096  ;;  %p811_p11 = scmp.lt.s32.totalorder %s48_s15, %s48_s15 }
  0x1b   :  { %p807_p10 = scmp.ne.s32.totalorder %s48_s15, %s806_s19  ;;  %p812_p12 = scmp.lt.s32.totalorder %s806_s19, %s806_s19 }
  0x1d   :  { %p813_p13 = por %p812_p12, %p811_p11 }
  0x1f   :  { %p814_p0 = pnand %p813_p13, %p807_p10 }
  0x21   :  { %817 = shalt.err (!%p814_p0)
}
  0x22   :  { %53 = dma.hbm_to_vmem [thread:$0]  %s952_s4, 4096, %s48_s15, [#allocation8], %s867_s30, %s867_s30, %s868_s9  }
  0x23   :  { %s871_s21 = smov [#allocation10]  }
  0x24   :  { %s61_s22 = sshll.u32 %s871_s21, 4  ;;  %s62_s22 = int_to_ptr.vmem [resolvable:$true] %s61_s22 }
  0x25   :  { %s826_s23 = scalar_lea.vmem %s62_s22, 2048  ;;  %p831_p2 = scmp.lt.s32.totalorder %s62_s22, %s62_s22 }
  0x26   :  { %p827_p1 = scmp.ne.s32.totalorder %s62_s22, %s826_s23  ;;  %p832_p3 = scmp.lt.s32.totalorder %s826_s23, %s826_s23 }
  0x28   :  { %p833_p4 = por %p832_p3, %p831_p2 }
  0x2a   :  { %p834_p5 = pnand %p833_p4, %p827_p1 }
  0x2c   :  { %837 = shalt.err (!%p834_p5)
}
  0x2d   :  { %s872_s1 = smov 64   ;;  %s873_s24 = smov 4  }
  0x2e   :  { %67 = dma.hbm_to_vmem [thread:$0]  %s954_s6, 2048, %s62_s22, [#allocation11], %s872_s1, %s872_s1, %s873_s24  }
  0x2f   :  { %858 = dma.done.wait [#allocation5], 128  }
  0x30   :  { %859 = vsyncadd [#allocation5], 4294967168 }
  0x31   :  { %860 = dma.done.wait [#allocation8], 4352  }
  0x32   :  { %861 = vsyncadd [#allocation8], 4294962944 }
  0x33   :  { %862 = dma.done.wait [#allocation11], 2048  }
  0x34   :  { %863 = vsyncadd [#allocation11], 4294965248  ;;  %v874_v0 = vmov 0   ;;  %v689_v1 = vld [vmem:[#allocation7 + $0x4] ss:$8 sps:$4 sm:$0xff]   ;;  %v83_v3 = vld [vmem:[#allocation4] sm:$0xff]  ;;  %v89_v49 = vlaneseq }
  0x35   :  { %145 = vmatprep.mubr.bf16.mxu0 %v874_v0  ;;  %v691_v2 = vld [vmem:[#allocation7] ss:$8 sps:$4 sm:$0xff]   ;;  %127 = vmatprep.subr.bf16.mxu0 %v689_v1  ;;  %v84_v4 = vpack.c.bf16 %v83_v3, %v83_v3  ;;  %v692_v5 = vld [vmem:[#allocation9 + $0x74] ss:$8 sps:$4 sm:$0xff]   ;;  %vm109_vm0 = vcmask 130048   ;;  %v744_v41 = vld [vmem:[#allocation10 + $0x68] sm:$0xff]  }
  0x36   :  { %v694_v6 = vld [vmem:[#allocation9 + $0x70] ss:$8 sps:$4 sm:$0xff]   ;;  %128 = vmatpush1.bf16.msra.mxu0 %v691_v2  ;;  %v695_v7 = vld [vmem:[#allocation9 + $0x64] ss:$8 sps:$4 sm:$0xff]   ;;  %362 = vmatprep.subr.bf16.mxu1 %v692_v5  ;;  %v697_v8 = vld [vmem:[#allocation9 + $0x60] ss:$8 sps:$4 sm:$0xff]  }
  0x37   :  { %363 = vmatpush1.bf16.msra.mxu1 %v694_v6  ;;  %v698_v9 = vld [vmem:[#allocation9 + $0x54] ss:$8 sps:$4 sm:$0xff]   ;;  %v700_v10 = vld [vmem:[#allocation9 + $0x50] ss:$8 sps:$4 sm:$0xff]   ;;  %v701_v11 = vld [vmem:[#allocation9 + $0x44] ss:$8 sps:$4 sm:$0xff]  }
  0x38   :  { %364 = vmatprep.subr.bf16.mxu1 %v695_v7  ;;  %v703_v12 = vld [vmem:[#allocation9 + $0x40] ss:$8 sps:$4 sm:$0xff]   ;;  %v704_v13 = vld [vmem:[#allocation9 + $0x34] ss:$8 sps:$4 sm:$0xff]   ;;  %v706_v14 = vld [vmem:[#allocation9 + $0x30] ss:$8 sps:$4 sm:$0xff]  }
  0x39   :  { %607 = vmatmul.mubr.msk.bf16.vlgmr.msra.gmra.mxu0 %vm109_vm0, %v84_v4  ;;  %v707_v15 = vld [vmem:[#allocation9 + $0x24] ss:$8 sps:$4 sm:$0xff]   ;;  %v709_v16 = vld [vmem:[#allocation9 + $0x20] ss:$8 sps:$4 sm:$0xff]   ;;  %v710_v17 = vld [vmem:[#allocation9 + $0x14] ss:$8 sps:$4 sm:$0xff]  }
  0x3a   :  { %v712_v18 = vld [vmem:[#allocation9 + $0x10] ss:$8 sps:$4 sm:$0xff]   ;;  %v713_v19 = vld [vmem:[#allocation9 + $0x4] ss:$8 sps:$4 sm:$0xff]   ;;  %v715_v20 = vld [vmem:[#allocation9] ss:$8 sps:$4 sm:$0xff]  }
  0x3b   :  { %365 = vmatpush1.bf16.msra.mxu1 %v697_v8  ;;  %v716_v21 = vld [vmem:[#allocation9 + $0xf4] ss:$8 sps:$4 sm:$0xff]   ;;  %v718_v22 = vld [vmem:[#allocation9 + $0xf0] ss:$8 sps:$4 sm:$0xff]   ;;  %v719_v23 = vld [vmem:[#allocation9 + $0xe4] ss:$8 sps:$4 sm:$0xff]  }
  0x3c   :  { %366 = vmatprep.subr.bf16.mxu1 %v698_v9  ;;  %v721_v24 = vld [vmem:[#allocation9 + $0xe0] ss:$8 sps:$4 sm:$0xff]   ;;  %v722_v25 = vld [vmem:[#allocation9 + $0xd4] ss:$8 sps:$4 sm:$0xff]   ;;  %v724_v26 = vld [vmem:[#allocation9 + $0xd0] ss:$8 sps:$4 sm:$0xff]  }
  0x3d   :  { %v725_v27 = vld [vmem:[#allocation9 + $0xc4] ss:$8 sps:$4 sm:$0xff]   ;;  %v727_v28 = vld [vmem:[#allocation9 + $0xc0] ss:$8 sps:$4 sm:$0xff]   ;;  %v728_v29 = vld [vmem:[#allocation9 + $0xb4] ss:$8 sps:$4 sm:$0xff]  }
  0x3e   :  { %v730_v30 = vld [vmem:[#allocation9 + $0xb0] ss:$8 sps:$4 sm:$0xff]   ;;  %v731_v31 = vld [vmem:[#allocation9 + $0xa4] ss:$8 sps:$4 sm:$0xff]   ;;  %v733_v32 = vld [vmem:[#allocation9 + $0xa0] ss:$8 sps:$4 sm:$0xff]  }
  0x3f   :  { %367 = vmatpush1.bf16.msra.mxu1 %v700_v10  ;;  %v734_v33 = vld [vmem:[#allocation9 + $0x94] ss:$8 sps:$4 sm:$0xff]   ;;  %v736_v34 = vld [vmem:[#allocation9 + $0x90] ss:$8 sps:$4 sm:$0xff]   ;;  %v737_v35 = vld [vmem:[#allocation9 + $0x84] ss:$8 sps:$4 sm:$0xff]  }
  0x40   :  { %368 = vmatprep.subr.bf16.mxu1 %v701_v11  ;;  %v739_v36 = vld [vmem:[#allocation9 + $0x80] ss:$8 sps:$4 sm:$0xff]   ;;  %v740_v37 = vld [vmem:[#allocation10 + $0x78] sm:$0xff]   ;;  %v742_v39 = vld [vmem:[#allocation10 + $0x70] sm:$0xff]   ;;  %v90_v50 = vshrl.u32 %v89_v49, 7  ;;  %s875_s9 = smov [#allocation12]  }
  0x41   :  { %v741_v38 = vld [vmem:[#allocation10 + $0x38] sm:$0xff]   ;;  %657 = vmatprep.subr.bf16.mxu0 %v740_v37  ;;  %v743_v40 = vld [vmem:[#allocation10 + $0x30] sm:$0xff]   ;;  %v745_v42 = vld [vmem:[#allocation10 + $0x28] sm:$0xff]   ;;  %s594_s10 = sshll.u32 %s875_s9, 4  ;;  %vm586_vm1 = vcmask 64512   ;;  %s595_s10 = int_to_ptr.vmem [resolvable:$true] %s594_s10 }
  0x42   :  { %658 = vmatpush3.bf16.msra.mxu0 %v741_v38  ;;  %v746_v43 = vld [vmem:[#allocation10 + $0x60] sm:$0xff]   ;;  %v748_v45 = vld [vmem:[#allocation10 + $0x58] sm:$0xff]   ;;  %v750_v47 = vld [vmem:[#allocation10 + $0x50] sm:$0xff]   ;;  %v91_v51 = vsub.s32 0, %v90_v50  ;;  %v95_v53 = vsub.s32 1, %v90_v50  ;;  %s838_s11 = scalar_lea.vmem %s595_s10, 128  ;;  %p843_p7 = scmp.lt.s32.totalorder %s595_s10, %s595_s10 }
  0x43   :  { %369 = vmatpush1.bf16.msra.mxu1 %v703_v12  ;;  %659 = vmatprep.subr.bf16.mxu0 %v742_v39  ;;  %v747_v44 = vld [vmem:[#allocation10 + $0x20] sm:$0xff]   ;;  %v749_v46 = vld [vmem:[#allocation10 + $0x18] sm:$0xff]   ;;  %v751_v48 = vld [vmem:[#allocation10 + $0x10] sm:$0xff]   ;;  %p839_p6 = scmp.ne.s32.totalorder %s595_s10, %s838_s11  ;;  %p844_p8 = scmp.lt.s32.totalorder %s838_s11, %s838_s11 }
  0x44   :  { %370 = vmatprep.subr.bf16.mxu1 %v704_v13  ;;  %v87_v52 = vld [vmem:[%s951_s3] sm:$0x3]  ;;  %v754_v4 = vld [vmem:[#allocation10 + $0x40] sm:$0xff]  }
  0x45   :  { %v92_v54 = vrot.slane %v87_v52, %v91_v51  ;;  %v96_v55 = vrot.slane %v87_v52, %v95_v53  ;;  %v752_v2 = vld [vmem:[#allocation10 + $0x48] sm:$0xff]   ;;  %v755_v5 = vld [vmem:[#allocation10] sm:$0xff]   ;;  %p845_p9 = por %p844_p8, %p843_p7 }
  0x46   :  { %660 = vmatpush3.bf16.msra.mxu0 %v743_v40  ;;  %v753_v3 = vld [vmem:[#allocation10 + $0x8] sm:$0xff]  }
  0x47   :  { %371 = vmatpush1.bf16.msra.mxu1 %v706_v14  ;;  %661 = vmatprep.subr.bf16.mxu0 %v744_v41  ;;  %v190_v6 = vld [vmem:[%s953_s5] sm:$0x3]  ;;  %p846_p10 = pnand %p845_p9, %p839_p6 }
  0x48   :  { %372 = vmatprep.subr.bf16.mxu1 %v707_v15  ;;  %v195_v7 = vrot.slane %v190_v6, %v91_v51  ;;  %v199_v8 = vrot.slane %v190_v6, %v95_v53 }
  0x4a   :  { %662 = vmatpush3.bf16.msra.mxu0 %v745_v42 }
  0x4b   :  { %373 = vmatpush1.bf16.msra.mxu1 %v709_v16  ;;  %663 = vmatprep.subr.bf16.mxu0 %v746_v43 }
  0x4c   :  { %374 = vmatprep.subr.bf16.mxu1 %v710_v17 }
  0x4e   :  { %664 = vmatpush3.bf16.msra.mxu0 %v747_v44 }
  0x4f   :  { %375 = vmatpush1.bf16.msra.mxu1 %v712_v18  ;;  %665 = vmatprep.subr.bf16.mxu0 %v748_v45 }
  0x50   :  { %376 = vmatprep.subr.bf16.mxu1 %v713_v19 }
  0x52   :  { %666 = vmatpush3.bf16.msra.mxu0 %v749_v46 }
  0x53   :  { %377 = vmatpush1.bf16.msra.mxu1 %v715_v20  ;;  %667 = vmatprep.subr.bf16.mxu0 %v750_v47  ;;  %v640_v20 = vld [vmem:[%s955_s7] ss:$0 sm:$0xff] }
  0x54   :  { %378 = vmatprep.subr.bf16.mxu1 %v716_v21 }
  0x56   :  { %668 = vmatpush3.bf16.msra.mxu0 %v751_v48 }
  0x57   :  { %379 = vmatpush2.bf16.msra.mxu1 %v718_v22  ;;  %669 = vmatprep.subr.bf16.mxu0 %v752_v2 }
  0x58   :  { %380 = vmatprep.subr.bf16.mxu1 %v719_v23 }
  0x5a   :  { %670 = vmatpush3.bf16.msra.mxu0 %v753_v3 }
  0x5b   :  { %381 = vmatpush2.bf16.msra.mxu1 %v721_v24  ;;  %671 = vmatprep.subr.bf16.mxu0 %v754_v4 }
  0x5c   :  { %382 = vmatprep.subr.bf16.mxu1 %v722_v25 }
  0x5e   :  { %672 = vmatpush3.bf16.msra.mxu0 %v755_v5 }
  0x5f   :  { %383 = vmatpush2.bf16.msra.mxu1 %v724_v26  ;;  %v584_v26 = vstv %s948_s0 }
  0x60   :  { %384 = vmatprep.subr.bf16.mxu1 %v725_v27 }
  0x63   :  { %385 = vmatpush2.bf16.msra.mxu1 %v727_v28 }
  0x64   :  { %386 = vmatprep.subr.bf16.mxu1 %v728_v29 }
  0x67   :  { %387 = vmatpush2.bf16.msra.mxu1 %v730_v30 }
  0x68   :  { %388 = vmatprep.subr.bf16.mxu1 %v731_v31 }
  0x6b   :  { %389 = vmatpush2.bf16.msra.mxu1 %v733_v32 }
  0x6c   :  { %390 = vmatprep.subr.bf16.mxu1 %v734_v33 }
  0x6f   :  { %391 = vmatpush2.bf16.msra.mxu1 %v736_v34 }
  0x70   :  { %392 = vmatprep.subr.bf16.mxu1 %v737_v35 }
  0x73   :  { %393 = vmatpush2.bf16.msra.mxu1 %v739_v36 }
  0xf9   :  { %v147_v56 = vpop.f32.mrf.mxu0 }
  0xfa   :  { %v148_v57 = vadd.f32 %v147_v56, %v92_v54 }
  0xfb   :  { %v149_v58 = vpop.f32.mrf.mxu0 }
  0xfc   :  { %v150_v59 = vadd.f32 %v149_v58, %v96_v55  ;;  %v154_v60 = vmax.f32 %v148_v57, 0.0 }
  0xfd   :  { %v151_v61 = vpop.f32.mrf.mxu0 }
  0xfe   :  { %v155_v62 = vmax.f32 %v150_v59, 0.0  ;;  %v156_v1 = vpack.c.bf16 %v154_v60, %v154_v60 }
  0xff   :  { %v152_v63 = vpop.f32.mrf.mxu0 }
 0x100   :  { %v157_v0 = vpack.c.bf16 %v155_v62, %v155_v62 }
 0x102   :  { %394 = vmatprep.mubr.bf16.mxu1 %v157_v0 }
 0x103   :  { %395 = vmatmul.mubr.bf16.vlgmr.msra.gmra.mxu1 %v156_v1 }
 0x1c3   :  { %v396_v9 = vpop.f32.mrf.mxu1 }
 0x1c4   :  { %v397_v10 = vadd.f32 %v396_v9, %v195_v7 }
 0x1c5   :  { %v398_v11 = vpop.f32.mrf.mxu1 }
 0x1c6   :  { %v399_v12 = vadd.f32 %v398_v11, %v199_v8  ;;  %v403_v13 = vmax.f32 %v397_v10, 0.0 }
 0x1c7   :  { %v400_v14 = vpop.f32.mrf.mxu1 }
 0x1c8   :  { %v404_v15 = vmax.f32 %v399_v12, 0.0  ;;  %v405_v18 = vpack.c.bf16 %v403_v13, %v403_v13 }
 0x1c9   :  { %v401_v16 = vpop.f32.mrf.mxu1 }
 0x1ca   :  { %v406_v17 = vpack.c.bf16 %v404_v15, %v404_v15 }
 0x1cc   :  { %574 = vmatprep.mubr.bf16.mxu0 %v406_v17 }
 0x1cd   :  { %575 = vmatmul.mubr.bf16.vlgmr.msra.gmra.mxu0 %v405_v18 }
 0x28d   :  { %v673_v19 = vpop.f32.mrf.mxu0 }
 0x28f   :  { %v674_v21 = vpop.f32.mrf.mxu0 }
 0x290   :  { %v675_v22 = vadd.f32 %v674_v21, %v673_v19 }
 0x291   :  { %v676_v23 = vpop.f32.mrf.mxu0 }
 0x292   :  { %v577_v24 = vadd.f32 %v675_v22, %v640_v20 }
 0x293   :  { %v677_v25 = vpop.f32.mrf.mxu0 }
 0x294   :  { %756 = vtanh.f32 %v577_v24 }
 0x2a1   :  { %v757_v27 = vpop.eup %756 }
 0x2a2   :  { %v585_v28 = vmul.f32 %v757_v27, %v584_v26 }
 0x2a4   :  { %587 = vst.msk [vmem:[#allocation12] sm:$0xff] %vm586_vm1, %v585_v28 }
 0x2a5   :  { %849 = shalt.err (!%p846_p10)
}
 0x2a6   :  { %597 = dma.vmem_to_hbm [thread:$0]  %s595_s10, 128, %s956_s8, [#allocation6]  }
 0x2a7   :  { %864 = dma.done.wait [#allocation6], 128  }
 0x2a8   :  { %865 = vsyncadd [#allocation6], 4294967168 }
 0x2a9   :  { %601 = vsyncpa [#allocation5], 1 }
 0x2aa   :  { %602 = vsyncpa [#allocation8], 1 }
 0x2ab   :  { %603 = vsyncpa [#allocation11], 1 }
 0x2ac   :  { %604 = vsyncpa [#allocation6], 1 }

</bundles_post_ra>
